<compile_context>
chip_gen: v6e
topology: v6e:2x2x1
jax: 0.10.0
libtpu: 0.0.40
codegen_flags: <defaults>
</compile_context>

<pallas_src>
import functools
import math

import jax
import jax.numpy as jnp
from jax.experimental import pallas as pl
from jax.experimental.pallas import tpu as pltpu


def _pe_add_kernel(x_ref, pe_ref, out_ref, *, batch: int):
    # x_ref: (seq_tile, B*E), pe_ref: (seq_tile, E) already in x's dtype.
    # Broadcast pe across the batch groups of the lane dim in-register.
    pe = pe_ref[...]
    if batch > 1:
        pe = jnp.tile(pe, (1, batch))          # (seq_tile, B*E), VMEM-only copy
    out_ref[...] = x_ref[...] + pe


def make_pos_embedding(emb_size: int, maxlen: int = 5000) -> jnp.ndarray:
    """Replicates PositionalEncoding.__init__ buffer: shape (maxlen, 1, emb_size)."""
    den = jnp.exp(-jnp.arange(0, emb_size, 2, dtype=jnp.float32)
                  * (math.log(10000.0) / emb_size))
    pos = jnp.arange(0, maxlen, dtype=jnp.float32).reshape(maxlen, 1)
    pe = jnp.zeros((maxlen, emb_size), dtype=jnp.float32)
    pe = pe.at[:, 0::2].set(jnp.sin(pos * den))
    pe = pe.at[:, 1::2].set(jnp.cos(pos * den))
    return pe[:, None, :]                       # (maxlen, 1, emb_size)


def _choose_seq_tile(S: int, B: int, E: int, itemsize: int) -> int:
    # Double-buffered working set per sequence row: 2 * (x_row + out_row + pe_row).
    row_bytes = 2 * (2 * B * E + E) * itemsize
    budget = 12 << 20                           # safe on v5e scoped / v7x 64 MiB VMEM
    tile = max(1, budget // max(row_bytes, 1))
    tile = min(tile, S)
    if S % 8 == 0:
        if S >= 32:
            tile = min(tile, S // 4)            # >= 4 grid steps: pipelining + 2 TCs
        tile = max(8, (tile // 8) * 8)          # sublane-aligned
        while S % tile != 0:                    # keep every tile full (no ragged tail)
            tile -= 8
    else:
        tile = S                                # small/ragged seq: one full-extent block
    return tile


def positional_encoding(token_embedding, pos_embedding, *, seq_tile=None):
    """token_embedding: (S, B, E); pos_embedding: (maxlen, 1, E) with maxlen >= S."""
    S, B, E = token_embedding.shape
    maxlen = pos_embedding.shape[0]
    assert S <= maxlen, "sequence longer than positional-encoding buffer"

    dtype = token_embedding.dtype
    itemsize = dtype.itemsize

    # Free, contiguous 2D view of the activations (lane dim = B*E).
    x2 = token_embedding.reshape(S, B * E)
    # Slice to the S rows actually used and cast the static buffer once.
    # TODO(synk): PyTorch would promote bf16 + fp32 buffer to fp32; we keep the
    # activation dtype (exact for the fp32 case exercised here).
    pe2 = pos_embedding[:S, 0, :].astype(dtype)          # (S, E)

    if seq_tile is None:
        seq_tile = _choose_seq_tile(S, B, E, itemsize)
    seq_tile = min(seq_tile, S)

    grid = (pl.cdiv(S, seq_tile),)

    # Scoped VMEM: actual double-buffered need + slack, clamped for v7x's 64 MiB.
    vmem_need = 2 * seq_tile * (2 * B * E + E) * itemsize
    vmem_limit = int(min(48 << 20, max(vmem_need + (4 << 20), 16 << 20)))

    out2 = pl.pallas_call(
        functools.partial(_pe_add_kernel, batch=B),
        out_shape=jax.ShapeDtypeStruct((S, B * E), dtype),
        grid=grid,
        in_specs=[
            pl.BlockSpec((seq_tile, B * E), lambda i: (i, 0)),   # activations
            pl.BlockSpec((seq_tile, E), lambda i: (i, 0)),       # pe rows
        ],
        out_specs=pl.BlockSpec((seq_tile, B * E), lambda i: (i, 0)),
        compiler_params=pltpu.CompilerParams(
            dimension_semantics=("parallel",),
            vmem_limit_bytes=vmem_limit,
        ),
    )(x2, pe2)

    return out2.reshape(S, B, E)


def reference_positional_encoding(x, pe):
    """Pure-JAX reference of the PyTorch forward."""
    return x + pe[: x.shape[0], :]


if __name__ == "__main__":
    key = jax.random.PRNGKey(0)
    k1, k2, k3 = jax.random.split(key, 3)

    # Small shapes implied by the module: seq=8, batch=2, emb=32, maxlen=64.
    S, B, E, maxlen = 8, 2, 32, 64
    x = jax.random.normal(k1, (S, B, E), jnp.float32)
    pe = make_pos_embedding(E, maxlen)
    out = jax.block_until_ready(positional_encoding(x, pe))
    ref = reference_positional_encoding(x, pe)
    assert out.shape == (S, B, E)
    assert jnp.allclose(out, ref, atol=1e-6, rtol=1e-6), "mismatch vs reference (small)"

    # Larger lane-dense case exercising the auto tile chooser (4 grid steps).
    S2, B2, E2, maxlen2 = 384, 4, 256, 512
    x2 = jax.random.normal(k2, (S2, B2, E2), jnp.float32)
    pe2 = make_pos_embedding(E2, maxlen2)
    out2 = jax.block_until_ready(positional_encoding(x2, pe2))
    ref2 = reference_positional_encoding(x2, pe2)
    assert jnp.allclose(out2, ref2, atol=1e-6, rtol=1e-6), "mismatch vs reference (tiled)"

    # Ragged sequence (not a multiple of 8) falls back to a full-extent block.
    S3, B3, E3, maxlen3 = 20, 2, 64, 64
    x3 = jax.random.normal(k3, (S3, B3, E3), jnp.float32)
    pe3 = make_pos_embedding(E3, maxlen3)
    out3 = jax.block_until_ready(positional_encoding(x3, pe3))
    ref3 = reference_positional_encoding(x3, pe3)
    assert jnp.allclose(out3, ref3, atol=1e-6, rtol=1e-6), "mismatch vs reference (ragged)"

    print("KERNEL_OK")
</pallas_src>

<mosaic_0001>
module attributes {stable_mosaic.version = 11 : i64} {
  func.func @_pe_add_kernel(%arg0: i32, %arg1: memref<8x64xf32, #tpu.memory_space<vmem>>, %arg2: memref<8x32xf32, #tpu.memory_space<vmem>>, %arg3: memref<8x64xf32, #tpu.memory_space<vmem>>) attributes {dimension_semantics = [#tpu.dimension_semantics<parallel>], iteration_bounds = array<i64: 1>, scalar_prefetch = 0 : i64, scratch_operands = 0 : i64, tpu.core_type = #tpu.core_type<tc>, window_params = [{transform_indices = @transform_0, window_bounds = array<i64: 8, 64>}, {transform_indices = @transform_1, window_bounds = array<i64: 8, 32>}, {transform_indices = @transform_2, window_bounds = array<i64: 8, 64>}]} {
    %c0 = arith.constant 0 : index
    %c0_0 = arith.constant 0 : index
    %0 = vector.load %arg2[%c0, %c0_0] : memref<8x32xf32, #tpu.memory_space<vmem>>, vector<8x32xf32>
    %1 = tpu.concatenate %0, %0 in 1 : vector<8x32xf32>, vector<8x32xf32> -> vector<8x64xf32>
    %c0_1 = arith.constant 0 : index
    %c0_2 = arith.constant 0 : index
    %2 = vector.load %arg1[%c0_1, %c0_2] : memref<8x64xf32, #tpu.memory_space<vmem>>, vector<8x64xf32>
    %3 = arith.addf %2, %1 : vector<8x64xf32>
    %c0_3 = arith.constant 0 : index
    %c0_4 = arith.constant 0 : index
    %4 = vector.load %arg3[%c0_3, %c0_4] : memref<8x64xf32, #tpu.memory_space<vmem>>, vector<8x64xf32>
    tpu.vector_store %arg3[%c0_3, %c0_4], %3 {strides = array<i32>} : memref<8x64xf32, #tpu.memory_space<vmem>>, vector<8x64xf32>,
    return
  }
  func.func @transform_0(%arg0: i32) -> (i32, i32) {
    %c0_i32 = arith.constant 0 : i32
    %c0_i32_0 = arith.constant 0 : i32
    return %arg0, %c0_i32 : i32, i32
  }
  func.func @transform_1(%arg0: i32) -> (i32, i32) {
    %c0_i32 = arith.constant 0 : i32
    %c0_i32_0 = arith.constant 0 : i32
    return %arg0, %c0_i32 : i32, i32
  }
  func.func @transform_2(%arg0: i32) -> (i32, i32) {
    %c0_i32 = arith.constant 0 : i32
    %c0_i32_0 = arith.constant 0 : i32
    return %arg0, %c0_i32 : i32, i32
  }
}

</mosaic_0001>

<bundles_post_ra>
// kernel: tpu_custom_call.1
= control target key start
LH: loop header
LB: loop body
LE: loop exit
PB: predicated region body
PF: predicated region fallthrough
CT: control target
= control target key end

     0   :  { %7 = vsyncpa [#allocation3], 0  ;;  %s161_s0 = inlined_call_operand.hbm [shape: f32[8,64], index: 0, kind: input, shape index: {}]   ;;  %s162_s1 = inlined_call_operand.hbm [shape: f32[8,32], index: 1, kind: input, shape index: {}]   ;;  %s163_s2 = inlined_call_operand.hbm [shape: f32[8,64], index: 2, kind: output, shape index: {}]  }
   0x1   :  { %8 = vsyncpa [#allocation6], 0 }
   0x2   :  { %9 = vsyncpa [#allocation4], 0  ;;  %s133_s9 = smov [#allocation2]   ;;  %s134_s11 = smov [#allocation5]  }
   0x3   :  { %s16_s10 = sshll.u32 %s133_s9, 4  ;;  %s26_s12 = sshll.u32 %s134_s11, 4  ;;  %s17_s10 = int_to_ptr.vmem [resolvable:$true] %s16_s10  ;;  %s27_s12 = int_to_ptr.vmem [resolvable:$true] %s26_s12 }
   0x4   :  { %s75_s13 = scalar_lea.vmem %s17_s10, 128  ;;  %p80_p1 = scmp.lt.s32.totalorder %s17_s10, %s17_s10 }
   0x5   :  { %p76_p0 = scmp.ne.s32.totalorder %s17_s10, %s75_s13  ;;  %p81_p2 = scmp.lt.s32.totalorder %s75_s13, %s75_s13 }
   0x7   :  { %p82_p3 = por %p81_p2, %p80_p1 }
   0x9   :  { %p83_p4 = pnand %p82_p3, %p76_p0 }
   0xb   :  { %86 = shalt.err (!%p83_p4)
}
   0xc   :  { %19 = dma.hbm_to_vmem [thread:$0]  %s161_s0, 128, %s17_s10, [#allocation3]  }
   0xd   :  { %s95_s16 = scalar_lea.vmem %s27_s12, 128  ;;  %p100_p6 = scmp.lt.s32.totalorder %s27_s12, %s27_s12 }
   0xe   :  { %p96_p5 = scmp.ne.s32.totalorder %s27_s12, %s95_s16  ;;  %p101_p7 = scmp.lt.s32.totalorder %s95_s16, %s95_s16 }
  0x10   :  { %p102_p8 = por %p101_p7, %p100_p6 }
  0x12   :  { %p103_p9 = pnand %p102_p8, %p96_p5 }
  0x14   :  { %106 = shalt.err (!%p103_p9)
}
  0x15   :  { %29 = dma.hbm_to_vmem [thread:$0]  %s162_s1, 128, %s27_s12, [#allocation6]  }
  0x16   :  { %127 = dma.done.wait [#allocation3], 128  }
  0x17   :  { %128 = vsyncadd [#allocation3], 4294967168 }
  0x18   :  { %129 = dma.done.wait [#allocation6], 128  }
  0x19   :  { %130 = vsyncadd [#allocation6], 4294967168  ;;  %v36_v0 = vld [vmem:[#allocation5] sm:$0xff]  ;;  %s135_s19 = smov 32   ;;  %vm41_vm0 = vcmask 261120   ;;  %v43_v1 = vld [vmem:[#allocation2] sm:$0xff] }
  0x1a   :  { %38 = vrot.lane.b32.xlu0 %v36_v0, %s135_s19  ;;  %s136_s0 = smov [#allocation7]   ;;  %vm45_vm1 = vcmask 523264  }
  0x1b   :  { %s53_s20 = sshll.u32 %s136_s0, 4  ;;  %s54_s20 = int_to_ptr.vmem [resolvable:$true] %s53_s20 }
  0x1c   :  { %s107_s21 = scalar_lea.vmem %s54_s20, 128  ;;  %p112_p11 = scmp.lt.s32.totalorder %s54_s20, %s54_s20 }
  0x1d   :  { %p108_p10 = scmp.ne.s32.totalorder %s54_s20, %s107_s21  ;;  %p113_p12 = scmp.lt.s32.totalorder %s107_s21, %s107_s21 }
  0x1f   :  { %p114_p13 = por %p113_p12, %p112_p11 }
  0x21   :  { %p115_p0 = pnand %p114_p13, %p108_p10 }
  0x8c   :  { %v39_v2 = vpop.permute.xlu0 %38 }
  0x8d   :  { %v42_v3 = vsel %vm41_vm0, %v36_v0, %v39_v2 }
  0x8e   :  { %v44_v4 = vadd.f32 %v43_v1, %v42_v3 }
  0x90   :  { %46 = vst.msk [vmem:[#allocation7] sm:$0xff] %vm45_vm1, %v44_v4 }
  0x91   :  { %118 = shalt.err (!%p115_p0)
}
  0x92   :  { %56 = dma.vmem_to_hbm [thread:$0]  %s54_s20, 128, %s163_s2, [#allocation4]  }
  0x93   :  { %131 = dma.done.wait [#allocation4], 128  }
  0x94   :  { %132 = vsyncadd [#allocation4], 4294967168 }
  0x95   :  { %60 = vsyncpa [#allocation3], 1 }
  0x96   :  { %61 = vsyncpa [#allocation6], 1 }
  0x97   :  { %62 = vsyncpa [#allocation4], 1 }

</bundles_post_ra>
